<compile_context>
chip_gen: v6e
topology: v6e:2x2x1
jax: 0.10.0
libtpu: 0.0.40
codegen_flags: <defaults>
</compile_context>

<pallas_src>
import functools

import jax
import jax.numpy as jnp
from jax.experimental import pallas as pl
from jax.experimental.pallas import tpu as pltpu


def _layernorm_kernel(x_ref, a_ref, b_ref, o_ref, *, eps, features):
    x = x_ref[...].astype(jnp.float32)                        # (tile_rows, F)
    a = a_ref[...]                                            # (1, F) f32
    b = b_ref[...]                                            # (1, F) f32

    # Fused single-pass reduction: one read of x for both moments.
    s1 = jnp.sum(x, axis=-1, keepdims=True)                   # (tile_rows, 1)
    s2 = jnp.sum(x * x, axis=-1, keepdims=True)               # (tile_rows, 1)
    mean = s1 * (1.0 / features)
    # torch.std default: unbiased estimator (divide by F - 1).
    # var = (sum(x^2) - F*mean^2) / (F-1); guard tiny negative from cancellation.
    var = jnp.maximum(s2 - mean * s1, 0.0) * (1.0 / (features - 1))
    std = jnp.sqrt(var)
    denom = std + eps
    # EUP approx reciprocal + one Newton-Raphson step (row-scalar shape, cheap).
    inv = pl.reciprocal(denom, approx=True)
    inv = inv * (2.0 - denom * inv)                           # (tile_rows, 1)

    # Single fused normalize/affine pass.
    o_ref[...] = ((x - mean) * inv * a + b).astype(o_ref.dtype)


def _vmem_capacity_bytes():
    """Physical VMEM on this generation, with a conservative (v7x) fallback."""
    try:
        info = pltpu.get_tpu_info()
        cap = int(getattr(info, "vmem_capacity_bytes", 0))
        if cap > 0:
            return cap
    except Exception:
        pass
    return 64 * 1024 * 1024


def _choose_tile_rows(rows, features, itemsize, vmem_bytes):
    """Pick a row tile: big enough to saturate HBM, small enough for VMEM,
    and small enough that the grid has several steps for pipeline overlap."""
    pack = 8 if itemsize >= 4 else 16          # f32 sublane pack = 8, bf16 = 16
    rows_padded = -(-rows // pack) * pack

    # Data budget ~60% of physical VMEM (leaves compiler scratch + headroom).
    budget = int(vmem_bytes * 0.6)
    # Per tile row: input + output double-buffered (4*itemsize*F) plus ~2
    # full-tile f32 temporaries (8*F) from the fused reduction/normalize.
    per_row = features * (4 * itemsize + 8)
    t_budget = max(pack, budget // per_row)

    # Target ~8 MiB of *input* per block so the ~0.35 us/step overhead is noise.
    t_target = max(pack, (8 * 1024 * 1024) // (features * itemsize))

    t = min(t_budget, t_target)
    t = max(pack, (t // pack) * pack)

    # Guarantee >= min_blocks grid steps (>= 2-3 per TC on v7x, and some
    # prefetch overlap on single-TC chips), unless the problem is tiny.
    min_blocks = 6
    t_cap = (rows_padded // min_blocks) // pack * pack
    if t_cap >= pack:
        t = min(t, t_cap)

    return int(max(pack, min(t, rows_padded)))


def layer_norm(x, a_2, b_2, eps=1e-6, *, tile_rows=None):
    """x: (..., features). a_2, b_2: (features,). Returns same shape/dtype as x."""
    orig_shape = x.shape
    features = orig_shape[-1]
    assert features > 1, "unbiased std needs features > 1 (divides by F - 1)"

    rows = 1
    for d in orig_shape[:-1]:
        rows *= d
    x2 = x.reshape(rows, features)

    itemsize = jnp.dtype(x.dtype).itemsize
    vmem_bytes = _vmem_capacity_bytes()
    if tile_rows is None:
        tile_rows = _choose_tile_rows(rows, features, itemsize, vmem_bytes)

    # Scoped VMEM limit: ~75% of physical (48 MiB on v7x, 96 MiB on v5e/v6e).
    vmem_limit = int(vmem_bytes * 0.75)

    grid = (pl.cdiv(rows, tile_rows),)
    kernel = functools.partial(_layernorm_kernel, eps=eps, features=features)

    # Params cast to f32 once host-side; constant index_map keeps them resident.
    a_f32 = a_2.astype(jnp.float32).reshape(1, features)
    b_f32 = b_2.astype(jnp.float32).reshape(1, features)

    out = pl.pallas_call(
        kernel,
        out_shape=jax.ShapeDtypeStruct((rows, features), x.dtype),
        grid_spec=pltpu.PrefetchScalarGridSpec(
            num_scalar_prefetch=0,
            grid=grid,
            in_specs=[
                pl.BlockSpec((tile_rows, features), lambda i: (i, 0)),
                pl.BlockSpec((1, features), lambda i: (0, 0)),
                pl.BlockSpec((1, features), lambda i: (0, 0)),
            ],
            out_specs=pl.BlockSpec((tile_rows, features), lambda i: (i, 0)),
        ),
        compiler_params=pltpu.CompilerParams(
            dimension_semantics=("parallel",),
            vmem_limit_bytes=vmem_limit,
        ),
    )(x2, a_f32, b_f32)

    return out.reshape(orig_shape)


if __name__ == "__main__":
    key = jax.random.PRNGKey(0)
    batch, seq, hidden = 2, 8, 32
    x = jax.random.normal(key, (batch, seq, hidden), dtype=jnp.float32)

    # Deterministic params, matching nn.Parameter(torch.ones/zeros(features)).
    a_2 = jnp.ones((hidden,), dtype=jnp.float32)
    b_2 = jnp.zeros((hidden,), dtype=jnp.float32)
    eps = 1e-6

    out = layer_norm(x, a_2, b_2, eps)
    out = jax.block_until_ready(out)

    # Reference (pure JAX) check of the spec's semantics: unbiased std, eps on std.
    mean = jnp.mean(x, axis=-1, keepdims=True)
    std = jnp.sqrt(jnp.sum((x - mean) ** 2, axis=-1, keepdims=True) / (hidden - 1))
    ref = a_2 * (x - mean) / (std + eps) + b_2
    assert jnp.allclose(out, ref, atol=1e-5, rtol=1e-5), "mismatch vs reference"

    print("KERNEL_OK")
</pallas_src>

<mosaic_0001>
module attributes {stable_mosaic.version = 11 : i64} {
  func.func @_layernorm_kernel(%arg0: i32, %arg1: memref<16x32xf32, #tpu.memory_space<vmem>>, %arg2: memref<1x32xf32, #tpu.memory_space<vmem>>, %arg3: memref<1x32xf32, #tpu.memory_space<vmem>>, %arg4: memref<16x32xf32, #tpu.memory_space<vmem>>) attributes {dimension_semantics = [#tpu.dimension_semantics<parallel>], iteration_bounds = array<i64: 1>, scalar_prefetch = 0 : i64, scratch_operands = 0 : i64, tpu.core_type = #tpu.core_type<tc>, window_params = [{transform_indices = @transform_0, window_bounds = array<i64: 16, 32>}, {pipeline_mode = #tpu.pipeline_mode<synchronous>, transform_indices = @transform_1, window_bounds = array<i64: 1, 32>}, {pipeline_mode = #tpu.pipeline_mode<synchronous>, transform_indices = @transform_2, window_bounds = array<i64: 1, 32>}, {transform_indices = @transform_3, window_bounds = array<i64: 16, 32>}]} {
    %c0 = arith.constant 0 : index
    %c0_0 = arith.constant 0 : index
    %0 = vector.load %arg1[%c0, %c0_0] : memref<16x32xf32, #tpu.memory_space<vmem>>, vector<16x32xf32>
    %c0_1 = arith.constant 0 : index
    %c0_2 = arith.constant 0 : index
    %1 = vector.load %arg2[%c0_1, %c0_2] : memref<1x32xf32, #tpu.memory_space<vmem>>, vector<1x32xf32>
    %c0_3 = arith.constant 0 : index
    %c0_4 = arith.constant 0 : index
    %2 = vector.load %arg3[%c0_3, %c0_4] : memref<1x32xf32, #tpu.memory_space<vmem>>, vector<1x32xf32>
    %cst = arith.constant dense<0.000000e+00> : vector<16xf32>
    %3 = vector.multi_reduction <add>, %0, %cst [1] : vector<16x32xf32> to vector<16xf32>
    %4 = vector.shape_cast %3 : vector<16xf32> to vector<16x1xf32>
    %5 = arith.mulf %0, %0 : vector<16x32xf32>
    %cst_5 = arith.constant dense<0.000000e+00> : vector<16xf32>
    %6 = vector.multi_reduction <add>, %5, %cst_5 [1] : vector<16x32xf32> to vector<16xf32>
    %7 = vector.shape_cast %6 : vector<16xf32> to vector<16x1xf32>
    %cst_6 = arith.constant 3.125000e-02 : f32
    %8 = vector.broadcast %cst_6 : f32 to vector<16x1xf32>
    %9 = arith.mulf %4, %8 : vector<16x1xf32>
    %10 = arith.mulf %9, %4 : vector<16x1xf32>
    %11 = arith.subf %7, %10 : vector<16x1xf32>
    %cst_7 = arith.constant 0.000000e+00 : f32
    %12 = vector.broadcast %cst_7 : f32 to vector<16x1xf32>
    %13 = arith.maximumf %11, %12 : vector<16x1xf32>
    %cst_8 = arith.constant 0.0322580636 : f32
    %14 = vector.broadcast %cst_8 : f32 to vector<16x1xf32>
    %15 = arith.mulf %13, %14 : vector<16x1xf32>
    %16 = math.sqrt %15 : vector<16x1xf32>
    %cst_9 = arith.constant 9.99999997E-7 : f32
    %17 = vector.broadcast %cst_9 : f32 to vector<16x1xf32>
    %18 = arith.addf %16, %17 : vector<16x1xf32>
    %19 = tpu.reciprocal %18 {approx = true} : vector<16x1xf32> -> vector<16x1xf32>
    %20 = arith.mulf %18, %19 : vector<16x1xf32>
    %cst_10 = arith.constant 2.000000e+00 : f32
    %21 = vector.broadcast %cst_10 : f32 to vector<16x1xf32>
    %22 = arith.subf %21, %20 : vector<16x1xf32>
    %23 = arith.mulf %19, %22 : vector<16x1xf32>
    %24 = vector.broadcast %9 : vector<16x1xf32> to vector<16x32xf32>
    %25 = arith.subf %0, %24 : vector<16x32xf32>
    %26 = vector.broadcast %23 : vector<16x1xf32> to vector<16x32xf32>
    %27 = arith.mulf %25, %26 : vector<16x32xf32>
    %28 = vector.broadcast %1 : vector<1x32xf32> to vector<16x32xf32>
    %29 = arith.mulf %27, %28 : vector<16x32xf32>
    %30 = vector.broadcast %2 : vector<1x32xf32> to vector<16x32xf32>
    %31 = arith.addf %29, %30 : vector<16x32xf32>
    %c0_11 = arith.constant 0 : index
    %c0_12 = arith.constant 0 : index
    %32 = vector.load %arg4[%c0_11, %c0_12] : memref<16x32xf32, #tpu.memory_space<vmem>>, vector<16x32xf32>
    tpu.vector_store %arg4[%c0_11, %c0_12], %31 {strides = array<i32>} : memref<16x32xf32, #tpu.memory_space<vmem>>, vector<16x32xf32>,
    return
  }
  func.func @transform_0(%arg0: i32) -> (i32, i32) {
    %c0_i32 = arith.constant 0 : i32
    %c0_i32_0 = arith.constant 0 : i32
    return %arg0, %c0_i32 : i32, i32
  }
  func.func @transform_1(%arg0: i32) -> (i32, i32) {
    %c0_i32 = arith.constant 0 : i32
    %c0_i32_0 = arith.constant 0 : i32
    %c0_i32_1 = arith.constant 0 : i32
    return %c0_i32, %c0_i32_0 : i32, i32
  }
  func.func @transform_2(%arg0: i32) -> (i32, i32) {
    %c0_i32 = arith.constant 0 : i32
    %c0_i32_0 = arith.constant 0 : i32
    %c0_i32_1 = arith.constant 0 : i32
    return %c0_i32, %c0_i32_0 : i32, i32
  }
  func.func @transform_3(%arg0: i32) -> (i32, i32) {
    %c0_i32 = arith.constant 0 : i32
    %c0_i32_0 = arith.constant 0 : i32
    return %arg0, %c0_i32 : i32, i32
  }
}

</mosaic_0001>

<bundles_post_ra>
// kernel: tpu_custom_call.1
= control target key start
LH: loop header
LB: loop body
LE: loop exit
PB: predicated region body
PF: predicated region fallthrough
CT: control target
= control target key end

     0   :  { %8 = vsyncpa [#allocation3], 0  ;;  %s227_s0 = inlined_call_operand.hbm [shape: f32[16,32], index: 0, kind: input, shape index: {}]   ;;  %s228_s1 = inlined_call_operand.vmem [shape: f32[1,32], index: 1, kind: input, shape index: {}]   ;;  %s229_s2 = inlined_call_operand.vmem [shape: f32[1,32], index: 2, kind: input, shape index: {}]   ;;  %s230_s3 = inlined_call_operand.hbm [shape: f32[16,32], index: 3, kind: output, shape index: {}]  }
   0x1   :  { %9 = vsyncpa [#allocation4], 0  ;;  %s179_s12 = smov [#allocation2]  }
   0x2   :  { %s15_s13 = sshll.u32 %s179_s12, 4  ;;  %s16_s13 = int_to_ptr.vmem [resolvable:$true] %s15_s13 }
   0x3   :  { %s143_s14 = scalar_lea.vmem %s16_s13, 256  ;;  %p148_p1 = scmp.lt.s32.totalorder %s16_s13, %s16_s13 }
   0x4   :  { %p144_p0 = scmp.ne.s32.totalorder %s16_s13, %s143_s14  ;;  %p149_p2 = scmp.lt.s32.totalorder %s143_s14, %s143_s14 }
   0x6   :  { %p150_p3 = por %p149_p2, %p148_p1 }
   0x8   :  { %p151_p4 = pnand %p150_p3, %p144_p0 }
   0xa   :  { %154 = shalt.err (!%p151_p4)
}
   0xb   :  { %s180_s15 = smov 128   ;;  %s181_s16 = smov 8  }
   0xc   :  { %21 = dma.hbm_to_vmem [thread:$0]  %s227_s0, 256, %s16_s13, [#allocation3], %s180_s15, %s180_s15, %s181_s16  }
   0xd   :  { %175 = dma.done.wait [#allocation3], 256  }
   0xe   :  { %176 = vsyncadd [#allocation3], 4294967040  ;;  %vm33_vm0 = vcmask 261120   ;;  %v29_v0 = vld [vmem:[#allocation2] sm:$0xff]  ;;  %v30_v1 = vld [vmem:[#allocation2 + $0x8] sm:$0xff]  ;;  %s182_s22 = smov [#allocation5]  }
   0xf   :  { %v34_v2 = vsel %vm33_vm0, %v29_v0, 0.0  ;;  %v40_v3 = vmul.f32 %v29_v0, %v29_v0  ;;  %v41_v4 = vmul.f32 %v30_v1, %v30_v1  ;;  %v37_v6 = vsel %vm33_vm0, %v30_v1, 0.0  ;;  %v121_v40 = vld [vmem:[%s228_s1] ss:$0 sm:$0xff]  ;;  %s109_s23 = sshll.u32 %s182_s22, 4  ;;  %s110_s23 = int_to_ptr.vmem [resolvable:$true] %s109_s23 }
  0x10   :  { %35 = vadd.xlane.f32.xlu0 %v34_v2  ;;  %v122_v43 = vld [vmem:[%s229_s2] ss:$0 sm:$0xff]  ;;  %s155_s1 = scalar_lea.vmem %s110_s23, 256  ;;  %p160_p6 = scmp.lt.s32.totalorder %s110_s23, %s110_s23 }
  0x11   :  { %v42_v5 = vsel %vm33_vm0, %v40_v3, 0.0  ;;  %v45_v7 = vsel %vm33_vm0, %v41_v4, 0.0  ;;  %p156_p5 = scmp.ne.s32.totalorder %s110_s23, %s155_s1  ;;  %p161_p7 = scmp.lt.s32.totalorder %s155_s1, %s155_s1 }
  0x12   :  { %43 = vadd.xlane.f32.xlu1 %v42_v5 }
  0x13   :  { %p162_p8 = por %p161_p7, %p160_p6 }
  0x14   :  { %38 = vadd.xlane.f32.xlu0 %v37_v6 }
  0x15   :  { %p163_p9 = pnand %p162_p8, %p156_p5 }
  0x16   :  { %46 = vadd.xlane.f32.xlu1 %v45_v7 }
  0x99   :  { %v36_v8 = vpop.xlane.xlu0 %35 }
  0x9a   :  { %v48_v9 = vmul.f32 0.03125, %v36_v8 }
  0x9b   :  { %v44_v10 = vpop.xlane.xlu1 %43 }
  0x9c   :  { %v50_v11 = vmul.f32 %v48_v9, %v36_v8  ;;  %v82_v38 = vsub.f32 %v29_v0, %v48_v9 }
  0x9d   :  { %v39_v12 = vpop.xlane.xlu0 %38 }
  0x9e   :  { %v52_v13 = vsub.f32 %v44_v10, %v50_v11  ;;  %v49_v14 = vmul.f32 0.03125, %v39_v12 }
  0x9f   :  { %v47_v15 = vpop.xlane.xlu1 %46 }
  0xa0   :  { %v54_v16 = vmax.f32 %v52_v13, 0.0  ;;  %v51_v17 = vmul.f32 %v49_v14, %v39_v12  ;;  %v83_v46 = vsub.f32 %v30_v1, %v49_v14 }
  0xa2   :  { %v56_v18 = vmul.f32 0.032258064, %v54_v16  ;;  %v53_v19 = vsub.f32 %v47_v15, %v51_v17 }
  0xa4   :  { %127 = vrsqrt.f32 %v56_v18  ;;  %v55_v20 = vmax.f32 %v53_v19, 0.0  ;;  %vm60_vm1 = vcmp.eq.f32.partialorder %v56_v18, inf  ;;  %v63_v24 = vand.u32 2147483648, %v56_v18 }
  0xa5   :  { %vm62_vm2 = vcmp.eq.f32.partialorder %v56_v18, 0.0 }
  0xa6   :  { %v57_v21 = vmul.f32 0.032258064, %v55_v20 }
  0xa8   :  { %129 = vrsqrt.f32 %v57_v21  ;;  %vm67_vm3 = vcmp.eq.f32.partialorder %v57_v21, inf  ;;  %v70_v30 = vand.u32 2147483648, %v57_v21  ;;  %vm69_vm4 = vcmp.eq.f32.partialorder %v57_v21, 0.0 }
  0xb1   :  { %v128_v22 = vpop.eup %127 }
  0xb2   :  { %v59_v23 = vmul.f32 %v128_v22, %v56_v18 }
  0xb4   :  { %v61_v25 = vsel %vm60_vm1, %v56_v18, %v59_v23 }
  0xb5   :  { %v64_v26 = vsel %vm62_vm2, %v63_v24, %v61_v25  ;;  %v130_v27 = vpop.eup %129 }
  0xb6   :  { %v72_v28 = vadd.f32 1e-06, %v64_v26  ;;  %v66_v29 = vmul.f32 %v130_v27, %v57_v21 }
  0xb8   :  { %131 = vrcp.f32 %v72_v28  ;;  %v68_v31 = vsel %vm67_vm3, %v57_v21, %v66_v29 }
  0xb9   :  { %v71_v32 = vsel %vm69_vm4, %v70_v30, %v68_v31 }
  0xba   :  { %v73_v33 = vadd.f32 1e-06, %v71_v32 }
  0xbc   :  { %133 = vrcp.f32 %v73_v33 }
  0xc5   :  { %v132_v34 = vpop.eup %131 }
  0xc6   :  { %v76_v35 = vmul.f32 %v132_v34, %v72_v28 }
  0xc8   :  { %v78_v36 = vsub.f32 2.0, %v76_v35 }
  0xc9   :  { %v134_v37 = vpop.eup %133 }
  0xca   :  { %v80_v39 = vmul.f32 %v132_v34, %v78_v36  ;;  %v77_v41 = vmul.f32 %v134_v37, %v73_v33 }
  0xcc   :  { %v84_v42 = vmul.f32 %v82_v38, %v80_v39  ;;  %v79_v44 = vsub.f32 2.0, %v77_v41 }
  0xce   :  { %v92_v45 = vmul.f32 %v121_v40, %v84_v42  ;;  %v81_v47 = vmul.f32 %v134_v37, %v79_v44 }
  0xd0   :  { %v100_v48 = vadd.f32 %v122_v43, %v92_v45  ;;  %v85_v49 = vmul.f32 %v83_v46, %v81_v47 }
  0xd2   :  { %102 = vst.msk [vmem:[#allocation5] sm:$0xff] %vm33_vm0, %v100_v48  ;;  %v93_v50 = vmul.f32 %v121_v40, %v85_v49 }
  0xd4   :  { %v101_v51 = vadd.f32 %v122_v43, %v93_v50 }
  0xd6   :  { %103 = vst.msk [vmem:[#allocation5 + $0x8] sm:$0xff] %vm33_vm0, %v101_v51 }
  0xd7   :  { %166 = shalt.err (!%p163_p9)
}
  0xd8   :  { %115 = dma.vmem_to_hbm [thread:$0]  %s110_s23, 256, %s230_s3, [#allocation4], %s180_s15, %s180_s15, %s181_s16  }
  0xd9   :  { %177 = dma.done.wait [#allocation4], 256  }
  0xda   :  { %178 = vsyncadd [#allocation4], 4294967040 }
  0xdb   :  { %119 = vsyncpa [#allocation3], 1 }
  0xdc   :  { %120 = vsyncpa [#allocation4], 1 }

</bundles_post_ra>
